<compile_context>
chip_gen: v7x
topology: tpu7x:2x2x1
jax: 0.10.0
libtpu: 0.0.40
codegen_flags: <defaults>
</compile_context>

<pallas_src>
import functools

import jax
import jax.numpy as jnp
from jax.experimental import pallas as pl
from jax.experimental.pallas import tpu as pltpu

# ---- model dims (small, consistent with the module) -------------------------
INPUT_SIZE = 64            # vocab size for the Embedding
HIDDEN = 32                # hidden_size
OUTPUT_SIZE = 64           # decoder output size
N_LAYERS = 1
CONTEXT = 2                # forward() consumes 2 embedded tokens -> GRU input = 2*HIDDEN
GATE_PAD = 128             # 3*HIDDEN = 96 gate columns, lane-padded to 128
O_PAD = ((OUTPUT_SIZE + 127) // 128) * 128   # lane-dense logits row width (128)
_UNROLL_MAX = 64           # fully unroll the in-kernel recurrence up to this T


# -----------------------------------------------------------------------------
# Kernel: embedding/input projection (batched) -> serial GRU recurrence ->
#         batched decoder.  Single invocation, everything VMEM-resident.
# -----------------------------------------------------------------------------
def _gru_seq_kernel(ids_ref,       # VMEM (T, 2)        int32  token ids per step
                    e0_ref,        # VMEM (V, GATE_PAD) f32    emb @ W_ih.T[:H]   (cols [r|z|n|0])
                    e1_ref,        # VMEM (V, GATE_PAD) f32    emb @ W_ih.T[H:2H]
                    bgi_ref,       # VMEM (1, GATE_PAD) f32    b_ih (padded)
                    whh_ref,       # VMEM (H, GATE_PAD) f32    W_hh.T (padded)
                    bhh_ref,       # VMEM (1, GATE_PAD) f32    b_hh (padded)
                    wdec_ref,      # VMEM (H, O_PAD)    f32    decoder W.T (padded)
                    bdec_ref,      # VMEM (1, O_PAD)    f32    decoder bias (padded)
                    h0_ref,        # VMEM (1, H)        f32    initial hidden
                    logits_ref,    # VMEM (T, O_PAD)    f32    OUT: lane-dense logits
                    hout_ref,      # VMEM (1, H)        f32    OUT: final hidden
                    gi_scr,        # VMEM (T, GATE_PAD) f32    scratch: input-side gate rows
                    h_scr):        # VMEM (T, H)        f32    scratch: h_t rows for the decoder
    T = logits_ref.shape[0]
    H = HIDDEN
    V = INPUT_SIZE

    # ---- pre-loop: embedding gather + input gate projection for ALL steps ----
    # One-hot rows picked via MXU matmuls against the pre-folded (emb @ W_ih.T)
    # tables -> gi_t = E0[id0_t] + E1[id1_t] + b_ih, batched over t.
    ids = ids_ref[...]                                              # (T, 2) int32
    lane = jax.lax.broadcasted_iota(jnp.int32, (T, V), 1)
    oh0 = (lane == ids[:, 0:1]).astype(jnp.float32)                 # (T, V)
    oh1 = (lane == ids[:, 1:2]).astype(jnp.float32)                 # (T, V)
    gi_scr[...] = (jnp.dot(oh0, e0_ref[...], preferred_element_type=jnp.float32)
                   + jnp.dot(oh1, e1_ref[...], preferred_element_type=jnp.float32)
                   + bgi_ref[...])                                  # (T, GATE_PAD)

    whh = whh_ref[...]                                              # load once (H, GATE_PAD)
    bhh = bhh_ref[...]                                              # (1, GATE_PAD)

    # ---- serial recurrence: per step only gh = h @ W_hh.T + b_hh + gates -----
    def step(t, h_prev):
        gh = jnp.dot(h_prev, whh, preferred_element_type=jnp.float32) + bhh   # (1, GATE_PAD)
        gi = gi_scr[pl.ds(t, 1), :]                                           # (1, GATE_PAD)
        r = jax.nn.sigmoid(gi[:, 0:H] + gh[:, 0:H])
        z = jax.nn.sigmoid(gi[:, H:2 * H] + gh[:, H:2 * H])
        n = jnp.tanh(gi[:, 2 * H:3 * H] + r * gh[:, 2 * H:3 * H])             # PyTorch n-gate
        h_new = (1.0 - z) * n + z * h_prev
        h_scr[pl.ds(t, 1), :] = h_new                                         # collect for decoder
        return h_new

    h = h0_ref[...]
    if T <= _UNROLL_MAX:
        for t in range(T):              # full unroll: max visibility for the scheduler
            h = step(t, h)
    else:
        h = jax.lax.fori_loop(0, T, step, h, unroll=8)
    hout_ref[...] = h

    # ---- post-loop: batched decoder, one (T,H)@(H,O_PAD) matmul --------------
    logits_ref[...] = (jnp.dot(h_scr[...], wdec_ref[...],
                               preferred_element_type=jnp.float32)
                       + bdec_ref[...])


# -----------------------------------------------------------------------------
# pallas_call wrapper
# -----------------------------------------------------------------------------
@functools.partial(jax.jit, static_argnames=("seq_len",))
def _run_sequence(ids, h0, kp, *, seq_len):
    vmem = pl.BlockSpec(memory_space=pltpu.MemorySpace.VMEM)   # whole array in VMEM
    logits_pad, h_final = pl.pallas_call(
        _gru_seq_kernel,
        out_shape=(
            jax.ShapeDtypeStruct((seq_len, O_PAD), jnp.float32),
            jax.ShapeDtypeStruct((1, HIDDEN), jnp.float32),
        ),
        in_specs=[vmem] * 9,
        out_specs=(vmem, vmem),
        scratch_shapes=[
            pltpu.VMEM((seq_len, GATE_PAD), jnp.float32),   # gi rows
            pltpu.VMEM((seq_len, HIDDEN), jnp.float32),     # h_t rows
        ],
    )(ids, kp["e0"], kp["e1"], kp["b_gi"], kp["w_hh"], kp["b_hh"],
      kp["w_dec"], kp["b_dec"], h0)
    return logits_pad, h_final


def rnn_forward_sequence(token_ids, hidden, kparams):
    """Apply RNN.forward T times (externally supplied inputs) in ONE fused kernel.

    token_ids : (T, CONTEXT) int32
    hidden    : (N_LAYERS, 1, HIDDEN) float32
    returns   : (logits (T, OUTPUT_SIZE), hidden (N_LAYERS, 1, HIDDEN))
    """
    T = int(token_ids.shape[0])
    ids = token_ids.reshape(T, CONTEXT).astype(jnp.int32)
    h0 = hidden.reshape(1, HIDDEN).astype(jnp.float32)
    logits_pad, h_final = _run_sequence(ids, h0, kparams, seq_len=T)
    logits = logits_pad[:, :OUTPUT_SIZE]
    return logits, h_final.reshape(N_LAYERS, 1, HIDDEN)


def rnn_forward(token_ids, hidden, kparams):
    """Exact equivalent of RNN.forward(input, hidden) — a single step."""
    logits, h = rnn_forward_sequence(token_ids.reshape(1, CONTEXT), hidden, kparams)
    return logits.reshape(1, OUTPUT_SIZE), h


# -----------------------------------------------------------------------------
# Parameters
# -----------------------------------------------------------------------------
def init_params(key):
    """PyTorch-layout parameters mirroring the module's __init__ shapes."""
    ks = jax.random.split(key, 7)
    scale = 1.0 / jnp.sqrt(jnp.float32(HIDDEN))
    u = lambda k, shp: jax.random.uniform(k, shp, jnp.float32, -scale, scale)
    return {
        "embedding": jax.random.normal(ks[0], (INPUT_SIZE, HIDDEN), jnp.float32),
        "w_ih": u(ks[1], (3 * HIDDEN, 2 * HIDDEN)),   # nn.GRU weight_ih_l0 (rows: r,z,n)
        "w_hh": u(ks[2], (3 * HIDDEN, HIDDEN)),       # nn.GRU weight_hh_l0
        "b_ih": u(ks[3], (3 * HIDDEN,)),
        "b_hh": u(ks[4], (3 * HIDDEN,)),
        "w_dec": u(ks[5], (OUTPUT_SIZE, HIDDEN)),     # nn.Linear weight
        "b_dec": u(ks[6], (OUTPUT_SIZE,)),
    }


def prepare_params(params):
    """One-time repack (all f32):
       * pre-fold emb @ W_ih.T into per-token gate tables E0/E1,
       * lane-pad gate / decoder matrices and biases to 128-wide columns."""
    H = HIDDEN
    hi = jax.lax.Precision.HIGHEST
    w_ih_t = params["w_ih"].T            # (2H, 3H), columns ordered [r | z | n]
    w_hh_t = params["w_hh"].T            # (H, 3H)
    emb = params["embedding"]            # (V, H)

    e0 = jnp.dot(emb, w_ih_t[:H, :], precision=hi)    # (V, 3H): emb[v] @ W_ih.T (first token slot)
    e1 = jnp.dot(emb, w_ih_t[H:, :], precision=hi)    # (V, 3H): second token slot

    def pad_cols(a, width):
        a = jnp.asarray(a, jnp.float32)
        return jnp.zeros((a.shape[0], width), jnp.float32).at[:, :a.shape[1]].set(a)

    return {
        "e0": pad_cols(e0, GATE_PAD),
        "e1": pad_cols(e1, GATE_PAD),
        "b_gi": pad_cols(params["b_ih"].reshape(1, 3 * H), GATE_PAD),
        "w_hh": pad_cols(w_hh_t, GATE_PAD),
        "b_hh": pad_cols(params["b_hh"].reshape(1, 3 * H), GATE_PAD),
        "w_dec": pad_cols(params["w_dec"].T, O_PAD),   # (H, O) -> (H, 128)
        "b_dec": pad_cols(params["b_dec"].reshape(1, -1), O_PAD),
    }


# -----------------------------------------------------------------------------
# Pure-JAX reference (un-fused, PyTorch-style math, f32) for correctness checks.
# -----------------------------------------------------------------------------
def _reference_forward_sequence(token_ids, hidden, params):
    H = HIDDEN
    dot = functools.partial(jnp.dot, precision=jax.lax.Precision.HIGHEST)
    emb = params["embedding"]
    w_ih_t, w_hh_t = params["w_ih"].T, params["w_hh"].T
    w_dec_t = params["w_dec"].T
    b_ih, b_hh = params["b_ih"][None, :], params["b_hh"][None, :]
    b_dec = params["b_dec"][None, :]

    h = hidden.reshape(1, H).astype(jnp.float32)
    outs = []
    for t in range(token_ids.shape[0]):
        x = emb[token_ids[t]].reshape(1, CONTEXT * H)
        gi = dot(x, w_ih_t) + b_ih
        gh = dot(h, w_hh_t) + b_hh
        r = jax.nn.sigmoid(gi[:, :H] + gh[:, :H])
        z = jax.nn.sigmoid(gi[:, H:2 * H] + gh[:, H:2 * H])
        n = jnp.tanh(gi[:, 2 * H:] + r * gh[:, 2 * H:])
        h = (1.0 - z) * n + z * h
        outs.append(dot(h, w_dec_t) + b_dec)
    return jnp.concatenate(outs, axis=0), h.reshape(N_LAYERS, 1, HIDDEN)


if __name__ == "__main__":
    key = jax.random.PRNGKey(0)
    k_param, k_tok = jax.random.split(key)

    params = init_params(k_param)
    kparams = prepare_params(params)          # one-time repack (outside the kernel)

    T = 8
    token_ids = jax.random.randint(k_tok, (T, CONTEXT), 0, INPUT_SIZE, dtype=jnp.int32)
    hidden0 = jnp.zeros((N_LAYERS, 1, HIDDEN), jnp.float32)    # init_hidden()

    # Fused multi-step path: one pallas_call for all T steps.
    logits, h_final = rnn_forward_sequence(token_ids, hidden0, kparams)
    # Single-step path: exactly RNN.forward(input, hidden).
    out1, h1 = rnn_forward(token_ids[0], hidden0, kparams)
    jax.block_until_ready((logits, h_final, out1, h1))

    ref_logits, ref_h = _reference_forward_sequence(token_ids, hidden0, params)
    ref_out1, ref_h1 = _reference_forward_sequence(token_ids[0:1], hidden0, params)

    assert logits.shape == (T, OUTPUT_SIZE)
    assert h_final.shape == (N_LAYERS, 1, HIDDEN)
    assert out1.shape == (1, OUTPUT_SIZE) and h1.shape == (N_LAYERS, 1, HIDDEN)
    assert jnp.allclose(logits, ref_logits, atol=1e-3, rtol=1e-3)
    assert jnp.allclose(h_final, ref_h, atol=1e-3, rtol=1e-3)
    assert jnp.allclose(out1, ref_out1, atol=1e-3, rtol=1e-3)
    assert jnp.allclose(h1, ref_h1, atol=1e-3, rtol=1e-3)

    print("KERNEL_OK")
</pallas_src>

<mosaic_0001>
module attributes {stable_mosaic.version = 11 : i64} {
  func.func @_gru_seq_kernel(%arg0: memref<8x2xi32, #tpu.memory_space<vmem>>, %arg1: memref<64x128xf32, #tpu.memory_space<vmem>>, %arg2: memref<64x128xf32, #tpu.memory_space<vmem>>, %arg3: memref<1x128xf32, #tpu.memory_space<vmem>>, %arg4: memref<32x128xf32, #tpu.memory_space<vmem>>, %arg5: memref<1x128xf32, #tpu.memory_space<vmem>>, %arg6: memref<32x128xf32, #tpu.memory_space<vmem>>, %arg7: memref<1x128xf32, #tpu.memory_space<vmem>>, %arg8: memref<1x32xf32, #tpu.memory_space<vmem>>, %arg9: memref<8x128xf32, #tpu.memory_space<vmem>>, %arg10: memref<1x32xf32, #tpu.memory_space<vmem>>, %arg11: memref<8x128xf32, #tpu.memory_space<vmem>>, %arg12: memref<8x32xf32, #tpu.memory_space<vmem>>) attributes {dimension_semantics = [], scalar_prefetch = 0 : i64, scratch_operands = 2 : i64, tpu.core_type = #tpu.core_type<tc>} {
    %c0 = arith.constant 0 : index
    %c0_0 = arith.constant 0 : index
    %0 = vector.load %arg0[%c0, %c0_0] : memref<8x2xi32, #tpu.memory_space<vmem>>, vector<8x2xi32>
    %1 = tpu.iota {dimensions = array<i32: 1>} : vector<8x64xi32>
    %2 = vector.extract_strided_slice %0 {offsets = [0, 0], sizes = [8, 1], strides = [1, 1]} : vector<8x2xi32> to vector<8x1xi32>
    %3 = vector.broadcast %2 : vector<8x1xi32> to vector<8x64xi32>
    %4 = arith.cmpi eq, %1, %3 : vector<8x64xi32>
    %5 = arith.extui %4 : vector<8x64xi1> to vector<8x64xi32>
    %6 = arith.sitofp %5 : vector<8x64xi32> to vector<8x64xf32>
    %7 = vector.extract_strided_slice %0 {offsets = [0, 1], sizes = [8, 1], strides = [1, 1]} : vector<8x2xi32> to vector<8x1xi32>
    %8 = vector.broadcast %7 : vector<8x1xi32> to vector<8x64xi32>
    %9 = arith.cmpi eq, %1, %8 : vector<8x64xi32>
    %10 = arith.extui %9 : vector<8x64xi1> to vector<8x64xi32>
    %11 = arith.sitofp %10 : vector<8x64xi32> to vector<8x64xf32>
    %c0_1 = arith.constant 0 : index
    %c0_2 = arith.constant 0 : index
    %12 = vector.load %arg1[%c0_1, %c0_2] : memref<64x128xf32, #tpu.memory_space<vmem>>, vector<64x128xf32>
    %cst = arith.constant dense<0.000000e+00> : vector<8x128xf32>
    %13 = tpu.matmul %6, %12, %cst {dimension_numbers = #tpu.dot_dimension_numbers<[1], [0], [0], [1], [0, 0, 1, 1], [], []>} : vector<8x64xf32>, vector<64x128xf32>, vector<8x128xf32> -> vector<8x128xf32>
    %c0_3 = arith.constant 0 : index
    %c0_4 = arith.constant 0 : index
    %14 = vector.load %arg2[%c0_3, %c0_4] : memref<64x128xf32, #tpu.memory_space<vmem>>, vector<64x128xf32>
    %cst_5 = arith.constant dense<0.000000e+00> : vector<8x128xf32>
    %15 = tpu.matmul %11, %14, %cst_5 {dimension_numbers = #tpu.dot_dimension_numbers<[1], [0], [0], [1], [0, 0, 1, 1], [], []>} : vector<8x64xf32>, vector<64x128xf32>, vector<8x128xf32> -> vector<8x128xf32>
    %16 = arith.addf %13, %15 : vector<8x128xf32>
    %c0_6 = arith.constant 0 : index
    %c0_7 = arith.constant 0 : index
    %17 = vector.load %arg3[%c0_6, %c0_7] : memref<1x128xf32, #tpu.memory_space<vmem>>, vector<1x128xf32>
    %18 = vector.broadcast %17 : vector<1x128xf32> to vector<8x128xf32>
    %19 = arith.addf %16, %18 : vector<8x128xf32>
    %c0_8 = arith.constant 0 : index
    %c0_9 = arith.constant 0 : index
    %20 = vector.load %arg11[%c0_8, %c0_9] : memref<8x128xf32, #tpu.memory_space<vmem>>, vector<8x128xf32>
    tpu.vector_store %arg11[%c0_8, %c0_9], %19 {strides = array<i32>} : memref<8x128xf32, #tpu.memory_space<vmem>>, vector<8x128xf32>,
    %c0_10 = arith.constant 0 : index
    %c0_11 = arith.constant 0 : index
    %21 = vector.load %arg4[%c0_10, %c0_11] : memref<32x128xf32, #tpu.memory_space<vmem>>, vector<32x128xf32>
    %c0_12 = arith.constant 0 : index
    %c0_13 = arith.constant 0 : index
    %22 = vector.load %arg5[%c0_12, %c0_13] : memref<1x128xf32, #tpu.memory_space<vmem>>, vector<1x128xf32>
    %c0_14 = arith.constant 0 : index
    %c0_15 = arith.constant 0 : index
    %23 = vector.load %arg8[%c0_14, %c0_15] : memref<1x32xf32, #tpu.memory_space<vmem>>, vector<1x32xf32>
    %cst_16 = arith.constant dense<0.000000e+00> : vector<1x128xf32>
    %24 = tpu.matmul %23, %21, %cst_16 {dimension_numbers = #tpu.dot_dimension_numbers<[1], [0], [0], [1], [0, 0, 1, 1], [], []>} : vector<1x32xf32>, vector<32x128xf32>, vector<1x128xf32> -> vector<1x128xf32>
    %25 = arith.addf %24, %22 : vector<1x128xf32>
    %c0_17 = arith.constant 0 : index
    %c0_18 = arith.constant 0 : index
    %26 = vector.load %arg11[%c0_17, %c0_18] : memref<8x128xf32, #tpu.memory_space<vmem>>, vector<1x128xf32>
    %27 = vector.extract_strided_slice %26 {offsets = [0, 0], sizes = [1, 32], strides = [1, 1]} : vector<1x128xf32> to vector<1x32xf32>
    %28 = vector.extract_strided_slice %25 {offsets = [0, 0], sizes = [1, 32], strides = [1, 1]} : vector<1x128xf32> to vector<1x32xf32>
    %29 = arith.addf %27, %28 : vector<1x32xf32>
    %30 = arith.negf %29 : vector<1x32xf32>
    %31 = math.exp %30 : vector<1x32xf32>
    %cst_19 = arith.constant 1.000000e+00 : f32
    %32 = vector.broadcast %cst_19 : f32 to vector<1x32xf32>
    %33 = arith.addf %32, %31 : vector<1x32xf32>
    %34 = arith.divf %32, %33 : vector<1x32xf32>
    %35 = vector.extract_strided_slice %26 {offsets = [0, 32], sizes = [1, 32], strides = [1, 1]} : vector<1x128xf32> to vector<1x32xf32>
    %36 = vector.extract_strided_slice %25 {offsets = [0, 32], sizes = [1, 32], strides = [1, 1]} : vector<1x128xf32> to vector<1x32xf32>
    %37 = arith.addf %35, %36 : vector<1x32xf32>
    %38 = arith.negf %37 : vector<1x32xf32>
    %39 = math.exp %38 : vector<1x32xf32>
    %cst_20 = arith.constant 1.000000e+00 : f32
    %40 = vector.broadcast %cst_20 : f32 to vector<1x32xf32>
    %41 = arith.addf %40, %39 : vector<1x32xf32>
    %42 = arith.divf %40, %41 : vector<1x32xf32>
    %43 = vector.extract_strided_slice %26 {offsets = [0, 64], sizes = [1, 32], strides = [1, 1]} : vector<1x128xf32> to vector<1x32xf32>
    %44 = vector.extract_strided_slice %25 {offsets = [0, 64], sizes = [1, 32], strides = [1, 1]} : vector<1x128xf32> to vector<1x32xf32>
    %45 = arith.mulf %34, %44 : vector<1x32xf32>
    %46 = arith.addf %43, %45 : vector<1x32xf32>
    %47 = math.tanh %46 : vector<1x32xf32>
    %cst_21 = arith.constant 1.000000e+00 : f32
    %48 = vector.broadcast %cst_21 : f32 to vector<1x32xf32>
    %49 = arith.subf %48, %42 : vector<1x32xf32>
    %50 = arith.mulf %49, %47 : vector<1x32xf32>
    %51 = arith.mulf %42, %23 : vector<1x32xf32>
    %52 = arith.addf %50, %51 : vector<1x32xf32>
    %c0_22 = arith.constant 0 : index
    %c0_23 = arith.constant 0 : index
    %53 = vector.load %arg12[%c0_22, %c0_23] : memref<8x32xf32, #tpu.memory_space<vmem>>, vector<1x32xf32>
    tpu.vector_store %arg12[%c0_22, %c0_23], %52 {strides = array<i32>} : memref<8x32xf32, #tpu.memory_space<vmem>>, vector<1x32xf32>,
    %cst_24 = arith.constant dense<0.000000e+00> : vector<1x128xf32>
    %54 = tpu.matmul %52, %21, %cst_24 {dimension_numbers = #tpu.dot_dimension_numbers<[1], [0], [0], [1], [0, 0, 1, 1], [], []>} : vector<1x32xf32>, vector<32x128xf32>, vector<1x128xf32> -> vector<1x128xf32>
    %55 = arith.addf %54, %22 : vector<1x128xf32>
    %c1 = arith.constant 1 : index
    %c0_25 = arith.constant 0 : index
    %56 = vector.load %arg11[%c1, %c0_25] : memref<8x128xf32, #tpu.memory_space<vmem>>, vector<1x128xf32>
    %57 = vector.extract_strided_slice %56 {offsets = [0, 0], sizes = [1, 32], strides = [1, 1]} : vector<1x128xf32> to vector<1x32xf32>
    %58 = vector.extract_strided_slice %55 {offsets = [0, 0], sizes = [1, 32], strides = [1, 1]} : vector<1x128xf32> to vector<1x32xf32>
    %59 = arith.addf %57, %58 : vector<1x32xf32>
    %60 = arith.negf %59 : vector<1x32xf32>
    %61 = math.exp %60 : vector<1x32xf32>
    %cst_26 = arith.constant 1.000000e+00 : f32
    %62 = vector.broadcast %cst_26 : f32 to vector<1x32xf32>
    %63 = arith.addf %62, %61 : vector<1x32xf32>
    %64 = arith.divf %62, %63 : vector<1x32xf32>
    %65 = vector.extract_strided_slice %56 {offsets = [0, 32], sizes = [1, 32], strides = [1, 1]} : vector<1x128xf32> to vector<1x32xf32>
    %66 = vector.extract_strided_slice %55 {offsets = [0, 32], sizes = [1, 32], strides = [1, 1]} : vector<1x128xf32> to vector<1x32xf32>
    %67 = arith.addf %65, %66 : vector<1x32xf32>
    %68 = arith.negf %67 : vector<1x32xf32>
    %69 = math.exp %68 : vector<1x32xf32>
    %cst_27 = arith.constant 1.000000e+00 : f32
    %70 = vector.broadcast %cst_27 : f32 to vector<1x32xf32>
    %71 = arith.addf %70, %69 : vector<1x32xf32>
    %72 = arith.divf %70, %71 : vector<1x32xf32>
    %73 = vector.extract_strided_slice %56 {offsets = [0, 64], sizes = [1, 32], strides = [1, 1]} : vector<1x128xf32> to vector<1x32xf32>
    %74 = vector.extract_strided_slice %55 {offsets = [0, 64], sizes = [1, 32], strides = [1, 1]} : vector<1x128xf32> to vector<1x32xf32>
    %75 = arith.mulf %64, %74 : vector<1x32xf32>
    %76 = arith.addf %73, %75 : vector<1x32xf32>
    %77 = math.tanh %76 : vector<1x32xf32>
    %cst_28 = arith.constant 1.000000e+00 : f32
    %78 = vector.broadcast %cst_28 : f32 to vector<1x32xf32>
    %79 = arith.subf %78, %72 : vector<1x32xf32>
    %80 = arith.mulf %79, %77 : vector<1x32xf32>
    %81 = arith.mulf %72, %52 : vector<1x32xf32>
    %82 = arith.addf %80, %81 : vector<1x32xf32>
    %c1_29 = arith.constant 1 : index
    %c0_30 = arith.constant 0 : index
    %83 = vector.load %arg12[%c1_29, %c0_30] : memref<8x32xf32, #tpu.memory_space<vmem>>, vector<1x32xf32>
    tpu.vector_store %arg12[%c1_29, %c0_30], %82 {strides = array<i32>} : memref<8x32xf32, #tpu.memory_space<vmem>>, vector<1x32xf32>,
    %cst_31 = arith.constant dense<0.000000e+00> : vector<1x128xf32>
    %84 = tpu.matmul %82, %21, %cst_31 {dimension_numbers = #tpu.dot_dimension_numbers<[1], [0], [0], [1], [0, 0, 1, 1], [], []>} : vector<1x32xf32>, vector<32x128xf32>, vector<1x128xf32> -> vector<1x128xf32>
    %85 = arith.addf %84, %22 : vector<1x128xf32>
    %c2 = arith.constant 2 : index
    %c0_32 = arith.constant 0 : index
    %86 = vector.load %arg11[%c2, %c0_32] : memref<8x128xf32, #tpu.memory_space<vmem>>, vector<1x128xf32>
    %87 = vector.extract_strided_slice %86 {offsets = [0, 0], sizes = [1, 32], strides = [1, 1]} : vector<1x128xf32> to vector<1x32xf32>
    %88 = vector.extract_strided_slice %85 {offsets = [0, 0], sizes = [1, 32], strides = [1, 1]} : vector<1x128xf32> to vector<1x32xf32>
    %89 = arith.addf %87, %88 : vector<1x32xf32>
    %90 = arith.negf %89 : vector<1x32xf32>
    %91 = math.exp %90 : vector<1x32xf32>
    %cst_33 = arith.constant 1.000000e+00 : f32
    %92 = vector.broadcast %cst_33 : f32 to vector<1x32xf32>
    %93 = arith.addf %92, %91 : vector<1x32xf32>
    %94 = arith.divf %92, %93 : vector<1x32xf32>
    %95 = vector.extract_strided_slice %86 {offsets = [0, 32], sizes = [1, 32], strides = [1, 1]} : vector<1x128xf32> to vector<1x32xf32>
    %96 = vector.extract_strided_slice %85 {offsets = [0, 32], sizes = [1, 32], strides = [1, 1]} : vector<1x128xf32> to vector<1x32xf32>
    %97 = arith.addf %95, %96 : vector<1x32xf32>
    %98 = arith.negf %97 : vector<1x32xf32>
    %99 = math.exp %98 : vector<1x32xf32>
    %cst_34 = arith.constant 1.000000e+00 : f32
    %100 = vector.broadcast %cst_34 : f32 to vector<1x32xf32>
    %101 = arith.addf %100, %99 : vector<1x32xf32>
    %102 = arith.divf %100, %101 : vector<1x32xf32>
    %103 = vector.extract_strided_slice %86 {offsets = [0, 64], sizes = [1, 32], strides = [1, 1]} : vector<1x128xf32> to vector<1x32xf32>
    %104 = vector.extract_strided_slice %85 {offsets = [0, 64], sizes = [1, 32], strides = [1, 1]} : vector<1x128xf32> to vector<1x32xf32>
    %105 = arith.mulf %94, %104 : vector<1x32xf32>
    %106 = arith.addf %103, %105 : vector<1x32xf32>
    %107 = math.tanh %106 : vector<1x32xf32>
    %cst_35 = arith.constant 1.000000e+00 : f32
    %108 = vector.broadcast %cst_35 : f32 to vector<1x32xf32>
    %109 = arith.subf %108, %102 : vector<1x32xf32>
    %110 = arith.mulf %109, %107 : vector<1x32xf32>
    %111 = arith.mulf %102, %82 : vector<1x32xf32>
    %112 = arith.addf %110, %111 : vector<1x32xf32>
    %c2_36 = arith.constant 2 : index
    %c0_37 = arith.constant 0 : index
    %113 = vector.load %arg12[%c2_36, %c0_37] : memref<8x32xf32, #tpu.memory_space<vmem>>, vector<1x32xf32>
    tpu.vector_store %arg12[%c2_36, %c0_37], %112 {strides = array<i32>} : memref<8x32xf32, #tpu.memory_space<vmem>>, vector<1x32xf32>,
    %cst_38 = arith.constant dense<0.000000e+00> : vector<1x128xf32>
    %114 = tpu.matmul %112, %21, %cst_38 {dimension_numbers = #tpu.dot_dimension_numbers<[1], [0], [0], [1], [0, 0, 1, 1], [], []>} : vector<1x32xf32>, vector<32x128xf32>, vector<1x128xf32> -> vector<1x128xf32>
    %115 = arith.addf %114, %22 : vector<1x128xf32>
    %c3 = arith.constant 3 : index
    %c0_39 = arith.constant 0 : index
    %116 = vector.load %arg11[%c3, %c0_39] : memref<8x128xf32, #tpu.memory_space<vmem>>, vector<1x128xf32>
    %117 = vector.extract_strided_slice %116 {offsets = [0, 0], sizes = [1, 32], strides = [1, 1]} : vector<1x128xf32> to vector<1x32xf32>
    %118 = vector.extract_strided_slice %115 {offsets = [0, 0], sizes = [1, 32], strides = [1, 1]} : vector<1x128xf32> to vector<1x32xf32>
    %119 = arith.addf %117, %118 : vector<1x32xf32>
    %120 = arith.negf %119 : vector<1x32xf32>
    %121 = math.exp %120 : vector<1x32xf32>
    %cst_40 = arith.constant 1.000000e+00 : f32
    %122 = vector.broadcast %cst_40 : f32 to vector<1x32xf32>
    %123 = arith.addf %122, %121 : vector<1x32xf32>
    %124 = arith.divf %122, %123 : vector<1x32xf32>
    %125 = vector.extract_strided_slice %116 {offsets = [0, 32], sizes = [1, 32], strides = [1, 1]} : vector<1x128xf32> to vector<1x32xf32>
    %126 = vector.extract_strided_slice %115 {offsets = [0, 32], sizes = [1, 32], strides = [1, 1]} : vector<1x128xf32> to vector<1x32xf32>
    %127 = arith.addf %125, %126 : vector<1x32xf32>
    %128 = arith.negf %127 : vector<1x32xf32>
    %129 = math.exp %128 : vector<1x32xf32>
    %cst_41 = arith.constant 1.000000e+00 : f32
    %130 = vector.broadcast %cst_41 : f32 to vector<1x32xf32>
    %131 = arith.addf %130, %129 : vector<1x32xf32>
    %132 = arith.divf %130, %131 : vector<1x32xf32>
    %133 = vector.extract_strided_slice %116 {offsets = [0, 64], sizes = [1, 32], strides = [1, 1]} : vector<1x128xf32> to vector<1x32xf32>
    %134 = vector.extract_strided_slice %115 {offsets = [0, 64], sizes = [1, 32], strides = [1, 1]} : vector<1x128xf32> to vector<1x32xf32>
    %135 = arith.mulf %124, %134 : vector<1x32xf32>
    %136 = arith.addf %133, %135 : vector<1x32xf32>
    %137 = math.tanh %136 : vector<1x32xf32>
    %cst_42 = arith.constant 1.000000e+00 : f32
    %138 = vector.broadcast %cst_42 : f32 to vector<1x32xf32>
    %139 = arith.subf %138, %132 : vector<1x32xf32>
    %140 = arith.mulf %139, %137 : vector<1x32xf32>
    %141 = arith.mulf %132, %112 : vector<1x32xf32>
    %142 = arith.addf %140, %141 : vector<1x32xf32>
    %c3_43 = arith.constant 3 : index
    %c0_44 = arith.constant 0 : index
    %143 = vector.load %arg12[%c3_43, %c0_44] : memref<8x32xf32, #tpu.memory_space<vmem>>, vector<1x32xf32>
    tpu.vector_store %arg12[%c3_43, %c0_44], %142 {strides = array<i32>} : memref<8x32xf32, #tpu.memory_space<vmem>>, vector<1x32xf32>,
    %cst_45 = arith.constant dense<0.000000e+00> : vector<1x128xf32>
    %144 = tpu.matmul %142, %21, %cst_45 {dimension_numbers = #tpu.dot_dimension_numbers<[1], [0], [0], [1], [0, 0, 1, 1], [], []>} : vector<1x32xf32>, vector<32x128xf32>, vector<1x128xf32> -> vector<1x128xf32>
    %145 = arith.addf %144, %22 : vector<1x128xf32>
    %c4 = arith.constant 4 : index
    %c0_46 = arith.constant 0 : index
    %146 = vector.load %arg11[%c4, %c0_46] : memref<8x128xf32, #tpu.memory_space<vmem>>, vector<1x128xf32>
    %147 = vector.extract_strided_slice %146 {offsets = [0, 0], sizes = [1, 32], strides = [1, 1]} : vector<1x128xf32> to vector<1x32xf32>
    %148 = vector.extract_strided_slice %145 {offsets = [0, 0], sizes = [1, 32], strides = [1, 1]} : vector<1x128xf32> to vector<1x32xf32>
    %149 = arith.addf %147, %148 : vector<1x32xf32>
    %150 = arith.negf %149 : vector<1x32xf32>
    %151 = math.exp %150 : vector<1x32xf32>
    %cst_47 = arith.constant 1.000000e+00 : f32
    %152 = vector.broadcast %cst_47 : f32 to vector<1x32xf32>
    %153 = arith.addf %152, %151 : vector<1x32xf32>
    %154 = arith.divf %152, %153 : vector<1x32xf32>
    %155 = vector.extract_strided_slice %146 {offsets = [0, 32], sizes = [1, 32], strides = [1, 1]} : vector<1x128xf32> to vector<1x32xf32>
    %156 = vector.extract_strided_slice %145 {offsets = [0, 32], sizes = [1, 32], strides = [1, 1]} : vector<1x128xf32> to vector<1x32xf32>
    %157 = arith.addf %155, %156 : vector<1x32xf32>
    %158 = arith.negf %157 : vector<1x32xf32>
    %159 = math.exp %158 : vector<1x32xf32>
    %cst_48 = arith.constant 1.000000e+00 : f32
    %160 = vector.broadcast %cst_48 : f32 to vector<1x32xf32>
    %161 = arith.addf %160, %159 : vector<1x32xf32>
    %162 = arith.divf %160, %161 : vector<1x32xf32>
    %163 = vector.extract_strided_slice %146 {offsets = [0, 64], sizes = [1, 32], strides = [1, 1]} : vector<1x128xf32> to vector<1x32xf32>
    %164 = vector.extract_strided_slice %145 {offsets = [0, 64], sizes = [1, 32], strides = [1, 1]} : vector<1x128xf32> to vector<1x32xf32>
    %165 = arith.mulf %154, %164 : vector<1x32xf32>
    %166 = arith.addf %163, %165 : vector<1x32xf32>
    %167 = math.tanh %166 : vector<1x32xf32>
    %cst_49 = arith.constant 1.000000e+00 : f32
    %168 = vector.broadcast %cst_49 : f32 to vector<1x32xf32>
    %169 = arith.subf %168, %162 : vector<1x32xf32>
    %170 = arith.mulf %169, %167 : vector<1x32xf32>
    %171 = arith.mulf %162, %142 : vector<1x32xf32>
    %172 = arith.addf %170, %171 : vector<1x32xf32>
    %c4_50 = arith.constant 4 : index
    %c0_51 = arith.constant 0 : index
    %173 = vector.load %arg12[%c4_50, %c0_51] : memref<8x32xf32, #tpu.memory_space<vmem>>, vector<1x32xf32>
    tpu.vector_store %arg12[%c4_50, %c0_51], %172 {strides = array<i32>} : memref<8x32xf32, #tpu.memory_space<vmem>>, vector<1x32xf32>,
    %cst_52 = arith.constant dense<0.000000e+00> : vector<1x128xf32>
    %174 = tpu.matmul %172, %21, %cst_52 {dimension_numbers = #tpu.dot_dimension_numbers<[1], [0], [0], [1], [0, 0, 1, 1], [], []>} : vector<1x32xf32>, vector<32x128xf32>, vector<1x128xf32> -> vector<1x128xf32>
    %175 = arith.addf %174, %22 : vector<1x128xf32>
    %c5 = arith.constant 5 : index
    %c0_53 = arith.constant 0 : index
    %176 = vector.load %arg11[%c5, %c0_53] : memref<8x128xf32, #tpu.memory_space<vmem>>, vector<1x128xf32>
    %177 = vector.extract_strided_slice %176 {offsets = [0, 0], sizes = [1, 32], strides = [1, 1]} : vector<1x128xf32> to vector<1x32xf32>
    %178 = vector.extract_strided_slice %175 {offsets = [0, 0], sizes = [1, 32], strides = [1, 1]} : vector<1x128xf32> to vector<1x32xf32>
    %179 = arith.addf %177, %178 : vector<1x32xf32>
    %180 = arith.negf %179 : vector<1x32xf32>
    %181 = math.exp %180 : vector<1x32xf32>
    %cst_54 = arith.constant 1.000000e+00 : f32
    %182 = vector.broadcast %cst_54 : f32 to vector<1x32xf32>
    %183 = arith.addf %182, %181 : vector<1x32xf32>
    %184 = arith.divf %182, %183 : vector<1x32xf32>
    %185 = vector.extract_strided_slice %176 {offsets = [0, 32], sizes = [1, 32], strides = [1, 1]} : vector<1x128xf32> to vector<1x32xf32>
    %186 = vector.extract_strided_slice %175 {offsets = [0, 32], sizes = [1, 32], strides = [1, 1]} : vector<1x128xf32> to vector<1x32xf32>
    %187 = arith.addf %185, %186 : vector<1x32xf32>
    %188 = arith.negf %187 : vector<1x32xf32>
    %189 = math.exp %188 : vector<1x32xf32>
    %cst_55 = arith.constant 1.000000e+00 : f32
    %190 = vector.broadcast %cst_55 : f32 to vector<1x32xf32>
    %191 = arith.addf %190, %189 : vector<1x32xf32>
    %192 = arith.divf %190, %191 : vector<1x32xf32>
    %193 = vector.extract_strided_slice %176 {offsets = [0, 64], sizes = [1, 32], strides = [1, 1]} : vector<1x128xf32> to vector<1x32xf32>
    %194 = vector.extract_strided_slice %175 {offsets = [0, 64], sizes = [1, 32], strides = [1, 1]} : vector<1x128xf32> to vector<1x32xf32>
    %195 = arith.mulf %184, %194 : vector<1x32xf32>
    %196 = arith.addf %193, %195 : vector<1x32xf32>
    %197 = math.tanh %196 : vector<1x32xf32>
    %cst_56 = arith.constant 1.000000e+00 : f32
    %198 = vector.broadcast %cst_56 : f32 to vector<1x32xf32>
    %199 = arith.subf %198, %192 : vector<1x32xf32>
    %200 = arith.mulf %199, %197 : vector<1x32xf32>
    %201 = arith.mulf %192, %172 : vector<1x32xf32>
    %202 = arith.addf %200, %201 : vector<1x32xf32>
    %c5_57 = arith.constant 5 : index
    %c0_58 = arith.constant 0 : index
    %203 = vector.load %arg12[%c5_57, %c0_58] : memref<8x32xf32, #tpu.memory_space<vmem>>, vector<1x32xf32>
    tpu.vector_store %arg12[%c5_57, %c0_58], %202 {strides = array<i32>} : memref<8x32xf32, #tpu.memory_space<vmem>>, vector<1x32xf32>,
    %cst_59 = arith.constant dense<0.000000e+00> : vector<1x128xf32>
    %204 = tpu.matmul %202, %21, %cst_59 {dimension_numbers = #tpu.dot_dimension_numbers<[1], [0], [0], [1], [0, 0, 1, 1], [], []>} : vector<1x32xf32>, vector<32x128xf32>, vector<1x128xf32> -> vector<1x128xf32>
    %205 = arith.addf %204, %22 : vector<1x128xf32>
    %c6 = arith.constant 6 : index
    %c0_60 = arith.constant 0 : index
    %206 = vector.load %arg11[%c6, %c0_60] : memref<8x128xf32, #tpu.memory_space<vmem>>, vector<1x128xf32>
    %207 = vector.extract_strided_slice %206 {offsets = [0, 0], sizes = [1, 32], strides = [1, 1]} : vector<1x128xf32> to vector<1x32xf32>
    %208 = vector.extract_strided_slice %205 {offsets = [0, 0], sizes = [1, 32], strides = [1, 1]} : vector<1x128xf32> to vector<1x32xf32>
    %209 = arith.addf %207, %208 : vector<1x32xf32>
    %210 = arith.negf %209 : vector<1x32xf32>
    %211 = math.exp %210 : vector<1x32xf32>
    %cst_61 = arith.constant 1.000000e+00 : f32
    %212 = vector.broadcast %cst_61 : f32 to vector<1x32xf32>
    %213 = arith.addf %212, %211 : vector<1x32xf32>
    %214 = arith.divf %212, %213 : vector<1x32xf32>
    %215 = vector.extract_strided_slice %206 {offsets = [0, 32], sizes = [1, 32], strides = [1, 1]} : vector<1x128xf32> to vector<1x32xf32>
    %216 = vector.extract_strided_slice %205 {offsets = [0, 32], sizes = [1, 32], strides = [1, 1]} : vector<1x128xf32> to vector<1x32xf32>
    %217 = arith.addf %215, %216 : vector<1x32xf32>
    %218 = arith.negf %217 : vector<1x32xf32>
    %219 = math.exp %218 : vector<1x32xf32>
    %cst_62 = arith.constant 1.000000e+00 : f32
    %220 = vector.broadcast %cst_62 : f32 to vector<1x32xf32>
    %221 = arith.addf %220, %219 : vector<1x32xf32>
    %222 = arith.divf %220, %221 : vector<1x32xf32>
    %223 = vector.extract_strided_slice %206 {offsets = [0, 64], sizes = [1, 32], strides = [1, 1]} : vector<1x128xf32> to vector<1x32xf32>
    %224 = vector.extract_strided_slice %205 {offsets = [0, 64], sizes = [1, 32], strides = [1, 1]} : vector<1x128xf32> to vector<1x32xf32>
    %225 = arith.mulf %214, %224 : vector<1x32xf32>
    %226 = arith.addf %223, %225 : vector<1x32xf32>
    %227 = math.tanh %226 : vector<1x32xf32>
    %cst_63 = arith.constant 1.000000e+00 : f32
    %228 = vector.broadcast %cst_63 : f32 to vector<1x32xf32>
    %229 = arith.subf %228, %222 : vector<1x32xf32>
    %230 = arith.mulf %229, %227 : vector<1x32xf32>
    %231 = arith.mulf %222, %202 : vector<1x32xf32>
    %232 = arith.addf %230, %231 : vector<1x32xf32>
    %c6_64 = arith.constant 6 : index
    %c0_65 = arith.constant 0 : index
    %233 = vector.load %arg12[%c6_64, %c0_65] : memref<8x32xf32, #tpu.memory_space<vmem>>, vector<1x32xf32>
    tpu.vector_store %arg12[%c6_64, %c0_65], %232 {strides = array<i32>} : memref<8x32xf32, #tpu.memory_space<vmem>>, vector<1x32xf32>,
    %cst_66 = arith.constant dense<0.000000e+00> : vector<1x128xf32>
    %234 = tpu.matmul %232, %21, %cst_66 {dimension_numbers = #tpu.dot_dimension_numbers<[1], [0], [0], [1], [0, 0, 1, 1], [], []>} : vector<1x32xf32>, vector<32x128xf32>, vector<1x128xf32> -> vector<1x128xf32>
    %235 = arith.addf %234, %22 : vector<1x128xf32>
    %c7 = arith.constant 7 : index
    %c0_67 = arith.constant 0 : index
    %236 = vector.load %arg11[%c7, %c0_67] : memref<8x128xf32, #tpu.memory_space<vmem>>, vector<1x128xf32>
    %237 = vector.extract_strided_slice %236 {offsets = [0, 0], sizes = [1, 32], strides = [1, 1]} : vector<1x128xf32> to vector<1x32xf32>
    %238 = vector.extract_strided_slice %235 {offsets = [0, 0], sizes = [1, 32], strides = [1, 1]} : vector<1x128xf32> to vector<1x32xf32>
    %239 = arith.addf %237, %238 : vector<1x32xf32>
    %240 = arith.negf %239 : vector<1x32xf32>
    %241 = math.exp %240 : vector<1x32xf32>
    %cst_68 = arith.constant 1.000000e+00 : f32
    %242 = vector.broadcast %cst_68 : f32 to vector<1x32xf32>
    %243 = arith.addf %242, %241 : vector<1x32xf32>
    %244 = arith.divf %242, %243 : vector<1x32xf32>
    %245 = vector.extract_strided_slice %236 {offsets = [0, 32], sizes = [1, 32], strides = [1, 1]} : vector<1x128xf32> to vector<1x32xf32>
    %246 = vector.extract_strided_slice %235 {offsets = [0, 32], sizes = [1, 32], strides = [1, 1]} : vector<1x128xf32> to vector<1x32xf32>
    %247 = arith.addf %245, %246 : vector<1x32xf32>
    %248 = arith.negf %247 : vector<1x32xf32>
    %249 = math.exp %248 : vector<1x32xf32>
    %cst_69 = arith.constant 1.000000e+00 : f32
    %250 = vector.broadcast %cst_69 : f32 to vector<1x32xf32>
    %251 = arith.addf %250, %249 : vector<1x32xf32>
    %252 = arith.divf %250, %251 : vector<1x32xf32>
    %253 = vector.extract_strided_slice %236 {offsets = [0, 64], sizes = [1, 32], strides = [1, 1]} : vector<1x128xf32> to vector<1x32xf32>
    %254 = vector.extract_strided_slice %235 {offsets = [0, 64], sizes = [1, 32], strides = [1, 1]} : vector<1x128xf32> to vector<1x32xf32>
    %255 = arith.mulf %244, %254 : vector<1x32xf32>
    %256 = arith.addf %253, %255 : vector<1x32xf32>
    %257 = math.tanh %256 : vector<1x32xf32>
    %cst_70 = arith.constant 1.000000e+00 : f32
    %258 = vector.broadcast %cst_70 : f32 to vector<1x32xf32>
    %259 = arith.subf %258, %252 : vector<1x32xf32>
    %260 = arith.mulf %259, %257 : vector<1x32xf32>
    %261 = arith.mulf %252, %232 : vector<1x32xf32>
    %262 = arith.addf %260, %261 : vector<1x32xf32>
    %c7_71 = arith.constant 7 : index
    %c0_72 = arith.constant 0 : index
    %263 = vector.load %arg12[%c7_71, %c0_72] : memref<8x32xf32, #tpu.memory_space<vmem>>, vector<1x32xf32>
    tpu.vector_store %arg12[%c7_71, %c0_72], %262 {strides = array<i32>} : memref<8x32xf32, #tpu.memory_space<vmem>>, vector<1x32xf32>,
    %c0_73 = arith.constant 0 : index
    %c0_74 = arith.constant 0 : index
    %264 = vector.load %arg10[%c0_73, %c0_74] : memref<1x32xf32, #tpu.memory_space<vmem>>, vector<1x32xf32>
    tpu.vector_store %arg10[%c0_73, %c0_74], %262 {strides = array<i32>} : memref<1x32xf32, #tpu.memory_space<vmem>>, vector<1x32xf32>,
    %c0_75 = arith.constant 0 : index
    %c0_76 = arith.constant 0 : index
    %265 = vector.load %arg12[%c0_75, %c0_76] : memref<8x32xf32, #tpu.memory_space<vmem>>, vector<8x32xf32>
    %c0_77 = arith.constant 0 : index
    %c0_78 = arith.constant 0 : index
    %266 = vector.load %arg6[%c0_77, %c0_78] : memref<32x128xf32, #tpu.memory_space<vmem>>, vector<32x128xf32>
    %cst_79 = arith.constant dense<0.000000e+00> : vector<8x128xf32>
    %267 = tpu.matmul %265, %266, %cst_79 {dimension_numbers = #tpu.dot_dimension_numbers<[1], [0], [0], [1], [0, 0, 1, 1], [], []>} : vector<8x32xf32>, vector<32x128xf32>, vector<8x128xf32> -> vector<8x128xf32>
    %c0_80 = arith.constant 0 : index
    %c0_81 = arith.constant 0 : index
    %268 = vector.load %arg7[%c0_80, %c0_81] : memref<1x128xf32, #tpu.memory_space<vmem>>, vector<1x128xf32>
    %269 = vector.broadcast %268 : vector<1x128xf32> to vector<8x128xf32>
    %270 = arith.addf %267, %269 : vector<8x128xf32>
    %c0_82 = arith.constant 0 : index
    %c0_83 = arith.constant 0 : index
    %271 = vector.load %arg9[%c0_82, %c0_83] : memref<8x128xf32, #tpu.memory_space<vmem>>, vector<8x128xf32>
    tpu.vector_store %arg9[%c0_82, %c0_83], %270 {strides = array<i32>} : memref<8x128xf32, #tpu.memory_space<vmem>>, vector<8x128xf32>,
    return
  }
}

</mosaic_0001>

<bundles_post_ra>
// kernel: _run_sequence.1
= control target key start
LH: loop header
LB: loop body
LE: loop exit
PB: predicated region body
PF: predicated region fallthrough
CT: control target
= control target key end

     0   :  { %16 = vsyncpa [#allocation5], 0  ;;  %s2017_s0 = inlined_call_operand.vmem [shape: s32[8,2], index: 0, kind: input, shape index: {}]   ;;  %s2018_s1 = inlined_call_operand.hbm [shape: f32[64,128], index: 1, kind: input, shape index: {}]   ;;  %s2019_s2 = inlined_call_operand.hbm [shape: f32[64,128], index: 2, kind: input, shape index: {}]   ;;  %s2020_s3 = inlined_call_operand.vmem [shape: f32[1,128], index: 3, kind: input, shape index: {}]   ;;  %s2021_s4 = inlined_call_operand.vmem [shape: f32[32,128], index: 4, kind: input, shape index: {}]   ;;  %s2022_s5 = inlined_call_operand.vmem [shape: f32[1,128], index: 5, kind: input, shape index: {}]   ;;  %s2023_s6 = inlined_call_operand.hbm [shape: f32[32,128], index: 6, kind: input, shape index: {}]   ;;  %s2024_s7 = inlined_call_operand.vmem [shape: f32[1,128], index: 7, kind: input, shape index: {}]   ;;  %s2025_s8 = inlined_call_operand.vmem [shape: f32[1,32], index: 8, kind: input, shape index: {}]   ;;  %s2026_s9 = inlined_call_operand.hbm [shape: f32[8,128], index: 9, kind: output, shape index: {0}]   ;;  %s2027_s10 = inlined_call_operand.hbm [shape: f32[1,32], index: 10, kind: output, shape index: {1}]  }
   0x1   :  { %17 = vsyncpa [#allocation8], 0 }
   0x2   :  { %18 = vsyncpa [#allocation6], 0 }
   0x3   :  { %19 = vsyncpa [#allocation12], 0  ;;  %s1714_s13 = smov [#allocation7]   ;;  %s1715_s15 = smov [#allocation4]  }
   0x4   :  { %s39_s14 = sshll.u32 %s1714_s13, 4  ;;  %s27_s16 = sshll.u32 %s1715_s15, 4  ;;  %s40_s14 = int_to_ptr.vmem [resolvable:$true] %s39_s14  ;;  %s1784_s16 = int_to_ptr.vmem [resolvable:$true] %s27_s16 }
   0x5   :  { %s1596_s19 = scalar_lea.hbm %s2019_s2, 1024 }
   0x6   :  { %p1597_p0 = scmp.ne.s32.totalorder %s2019_s2, %s1596_s19  ;;  %p1600_p1 = scmp.lt.u32.totalorder %s1596_s19, %s2019_s2 }
   0x8   :  { %p1602_p2 = pnand %p1600_p1, %p1597_p0 }
   0xa   :  { %1605 = shalt.err (!%p1602_p2)
}
   0xb   :  { %s1606_s24 = scalar_lea.vmem %s40_s14, 1024  ;;  %p1611_p4 = scmp.lt.s32.totalorder %s40_s14, %s40_s14 }
   0xc   :  { %p1607_p3 = scmp.ne.s32.totalorder %s40_s14, %s1606_s24  ;;  %p1612_p5 = scmp.lt.s32.totalorder %s1606_s24, %s1606_s24 }
   0xe   :  { %p1613_p6 = por %p1612_p5, %p1611_p4 }
  0x10   :  { %p1614_p7 = pnand %p1613_p6, %p1607_p3 }
  0x12   :  { %1617 = shalt.err (!%p1614_p7)
}
  0x13   :  { %s1716_s25 = smov 128   ;;  %s1717_s26 = smov 8  }
  0x14   :  { %45 = dma.hbm_to_vmem [thread:$0]  %s2019_s2, 1024, %s40_s14, [#allocation8], %s1716_s25, %s1716_s25, %s1717_s26  }
  0x15   :  { %s1618_s11 = scalar_lea.hbm %s2018_s1, 1024 }
  0x16   :  { %p1619_p8 = scmp.ne.s32.totalorder %s2018_s1, %s1618_s11  ;;  %p1622_p9 = scmp.lt.u32.totalorder %s1618_s11, %s2018_s1 }
  0x18   :  { %p1624_p10 = pnand %p1622_p9, %p1619_p8 }
  0x1a   :  { %1627 = shalt.err (!%p1624_p10)
}
  0x1b   :  { %s1628_s18 = scalar_lea.vmem %s1784_s16, 1024  ;;  %p1633_p12 = scmp.lt.s32.totalorder %s1784_s16, %s1784_s16 }
  0x1c   :  { %p1629_p11 = scmp.ne.s32.totalorder %s1784_s16, %s1628_s18  ;;  %p1634_p13 = scmp.lt.s32.totalorder %s1628_s18, %s1628_s18 }
  0x1e   :  { %p1635_p0 = por %p1634_p13, %p1633_p12 }
  0x20   :  { %p1636_p1 = pnand %p1635_p0, %p1629_p11 }
  0x22   :  { %1639 = shalt.err (!%p1636_p1)
}
  0x23   :  { %33 = dma.hbm_to_vmem [thread:$0]  %s2018_s1, 1024, %s1784_s16, [#allocation5], %s1716_s25, %s1716_s25, %s1717_s26  }
  0x24   :  { %s1718_s19 = smov [#allocation9]   ;;  %s1640_s23 = scalar_lea.hbm %s2023_s6, 512 }
  0x25   :  { %s57_s20 = sshll.u32 %s1718_s19, 4  ;;  %p1641_p2 = scmp.ne.s32.totalorder %s2023_s6, %s1640_s23  ;;  %s58_s20 = int_to_ptr.vmem [resolvable:$true] %s57_s20 }
  0x26   :  { %p1644_p3 = scmp.lt.u32.totalorder %s1640_s23, %s2023_s6 }
  0x28   :  { %p1646_p4 = pnand %p1644_p3, %p1641_p2 }
  0x2a   :  { %1649 = shalt.err (!%p1646_p4)
}
  0x2b   :  { %s1650_s30 = scalar_lea.vmem %s58_s20, 512  ;;  %p1655_p6 = scmp.lt.s32.totalorder %s58_s20, %s58_s20 }
  0x2c   :  { %p1651_p5 = scmp.ne.s32.totalorder %s58_s20, %s1650_s30  ;;  %p1656_p7 = scmp.lt.s32.totalorder %s1650_s30, %s1650_s30 }
  0x2e   :  { %p1657_p8 = por %p1656_p7, %p1655_p6 }
  0x30   :  { %p1658_p9 = pnand %p1657_p8, %p1651_p5 }
  0x32   :  { %1661 = shalt.err (!%p1658_p9)
}
  0x33   :  { %63 = dma.hbm_to_vmem [thread:$0]  %s2023_s6, 512, %s58_s20, [#allocation8], %s1716_s25, %s1716_s25, %s1717_s26  }
  0x34   :  { %1706 = dma.done.wait [#allocation5], 1024  }
  0x35   :  { %1707 = vsyncadd [#allocation5], 4294966272 }
  0x36   :  { %1708 = dma.done.wait [#allocation8], 1536  }
  0x37   :  { %1709 = vsyncadd [#allocation8], 4294965760  ;;  %v1719_v0 = vmov 1   ;;  %v1720_v1 = vmov 0.0|0.0   ;;  %v77_v2 = vld [vmem:[%s2017_s0] sm:$0xff]  ;;  %v100_v3 = vld [vmem:[#allocation7] sm:$0xff]  ;;  %v78_v24 = vlaneseq }
  0x38   :  { %1545 = vset.pattern.permute.xlu0 %v1719_v0  ;;  %1452 = vmatprep.subr.bf16.mxu0 %v1720_v1  ;;  %v101_v4 = vld [vmem:[#allocation7 + $0x8] sm:$0xff]  ;;  %v102_v6 = vld [vmem:[#allocation7 + $0x10] sm:$0xff]  ;;  %v103_v7 = vld [vmem:[#allocation7 + $0x18] sm:$0xff]  ;;  %vm1721_vm0 = vmmov 0   ;;  %v1722_v10 = vmov 0.0   ;;  %v1723_v17 = vmov 0  }
  0x39   :  { %1464 = vmatprep.subr.bf16.mxu1 %v1720_v1  ;;  %87 = vperm.xlu0 %1545, %v77_v2   ;;  %v1453_v5 = vpack.c.bf16 %v101_v4, %v100_v3  ;;  %v92_v8 = vld [vmem:[#allocation4] sm:$0xff]  ;;  %v93_v9 = vld [vmem:[#allocation4 + $0x8] sm:$0xff]  ;;  %v1456_v11 = vpack.c.bf16 %v103_v7, %v102_v6  ;;  %v94_v13 = vld [vmem:[#allocation4 + $0x10] sm:$0xff]  ;;  %v370_v29 = vshrl.u32 %v78_v24, 7  ;;  %s1724_s25 = smov 32   ;;  %v79_v34 = vand.u32 127, %v78_v24 }
  0x3a   :  { %1331 = vmatprep.mubr.msk.f32.mxu0 %vm1721_vm0, %v1722_v10  ;;  %1350 = vmatprep.mubr.msk.f32.mxu1 %vm1721_vm0, %v1722_v10  ;;  %v1465_v12 = vpack.c.bf16 %v93_v9, %v92_v8  ;;  %v95_v14 = vld [vmem:[#allocation4 + $0x18] sm:$0xff]  ;;  %v104_v15 = vld [vmem:[#allocation7 + $0x20] sm:$0xff]  ;;  %v105_v16 = vld [vmem:[#allocation7 + $0x28] sm:$0xff]  ;;  %vm108_vm1 = vcmask 523264   ;;  %vm270_vm4 = vcmask 261120   ;;  %s1725_s22 = smov 64  }
  0x3b   :  { %1454 = vmatpush3.bf16.msra.mxu0 %v1453_v5  ;;  %v1468_v18 = vpack.c.bf16 %v95_v14, %v94_v13  ;;  %v96_v19 = vld [vmem:[#allocation4 + $0x20] sm:$0xff]  ;;  %v97_v20 = vld [vmem:[#allocation4 + $0x28] sm:$0xff]  ;;  %v1459_v21 = vpack.c.bf16 %v105_v16, %v104_v15  ;;  %v106_v22 = vld [vmem:[#allocation7 + $0x30] sm:$0xff]  ;;  %v371_v31 = vsub.s32 0, %v370_v29  ;;  %vm382_vm5 = vcmask 253952  }
  0x3c   :  { %1455 = vmatprep.subr.bf16.mxu0 %v1720_v1  ;;  %1466 = vmatpush3.bf16.msra.mxu1 %v1465_v12  ;;  %v107_v23 = vld [vmem:[#allocation7 + $0x38] sm:$0xff]  ;;  %v1471_v25 = vpack.c.bf16 %v97_v20, %v96_v19  ;;  %v98_v26 = vld [vmem:[#allocation4 + $0x30] sm:$0xff]  ;;  %v269_v32 = vld [vmem:[%s2025_s8] sm:$0x1] }
  0x3d   :  { %1546 = vset.pattern.permute.xlu0 %v1723_v17  ;;  %1467 = vmatprep.subr.bf16.mxu1 %v1720_v1  ;;  %v99_v27 = vld [vmem:[#allocation4 + $0x38] sm:$0xff]  ;;  %v1462_v28 = vpack.c.bf16 %v107_v23, %v106_v22  ;;  %v372_v33 = vrot.slane %v269_v32, %v371_v31  ;;  %v264_v35 = vld [vmem:[%s2021_s4] sm:$0xff]  ;;  %v265_v36 = vld [vmem:[%s2021_s4 + $0x8] sm:$0xff] }
  0x3e   :  { %81 = vperm.xlu0 %1546, %v77_v2   ;;  %v1474_v30 = vpack.c.bf16 %v99_v27, %v98_v26  ;;  %v1862_v38 = vpack.c.bf16 %v265_v36, %v264_v35  ;;  %v266_v39 = vld [vmem:[%s2021_s4 + $0x10] sm:$0xff]  ;;  %v267_v40 = vld [vmem:[%s2021_s4 + $0x18] sm:$0xff]  ;;  %v1233_v48 = vld [vmem:[%s2020_s3] ss:$0 sm:$0xff]  ;;  %s1726_s3 = smov 96  }
  0x3f   :  { %1457 = vmatpush3.bf16.msra.mxu0 %v1456_v11  ;;  %v1872_v42 = vpack.c.bf16 %v267_v40, %v266_v39  ;;  %v1899_v50 = vld [vmem:[%s2022_s5] sm:$0x1]  ;;  %s1727_s5 = smov [#allocation11]  }
  0x40   :  { %1458 = vmatprep.subr.bf16.mxu0 %v1720_v1  ;;  %1469 = vmatpush3.bf16.msra.mxu1 %v1468_v18  ;;  %s1215_s23 = sshll.u32 %s1727_s5, 4  ;;  %s1216_s23 = int_to_ptr.vmem [resolvable:$true] %s1215_s23 }
  0x41   :  { %1470 = vmatprep.subr.bf16.mxu1 %v1720_v1  ;;  %s1662_s24 = scalar_lea.vmem %s1216_s23, 16  ;;  %s1666_s27 = scalar_lea.vmem %s1216_s23, 32 }
  0x42   :  { %1547 = vset.pattern.permute.xlu0 %v1719_v0  ;;  %p1663_p10 = scmp.ne.s32.totalorder %s1216_s23, %s1662_s24  ;;  %p1667_p11 = scmp.lt.s32.totalorder %s1216_s23, %s1216_s23 }
  0x43   :  { %1460 = vmatpush3.bf16.msra.mxu0 %v1459_v21  ;;  %373 = vrot.lane.b32.xlu0 %v372_v33, %s1724_s25  ;;  %p1668_p12 = scmp.lt.s32.totalorder %s1666_s27, %s1662_s24 }
  0x44   :  { %1461 = vmatprep.subr.bf16.mxu0 %v1720_v1  ;;  %1472 = vmatpush3.bf16.msra.mxu1 %v1471_v25 }
  0x45   :  { %1473 = vmatprep.subr.bf16.mxu1 %v1720_v1  ;;  %p1669_p13 = por %p1668_p12, %p1667_p11 }
  0x47   :  { %1463 = vmatpush3.bf16.msra.mxu0 %v1462_v28  ;;  %p1670_p0 = pnand %p1669_p13, %p1663_p10 }
  0x48   :  { %1476 = vmatprep.subr.bf16.mxu0 %v1720_v1  ;;  %1475 = vmatpush3.bf16.msra.mxu1 %v1474_v30 }
  0x49   :  { %1482 = vmatprep.subr.bf16.mxu1 %v1720_v1 }
  0xb8   :  { %v88_v37 = vpop.permute.xlu0 %87 }
  0xb9   :  { %vm89_vm2 = vcmp.eq.s32.totalorder %v79_v34, %v88_v37 }
  0xba   :  { %v1230_v41 = vsel %vm89_vm2, 1.0, %v1722_v10 }
  0xbb   :  { %1332 = vmatmul.mubr.msk.f32.vlgmr.msra.gmra.mrb[0].mxu0 %vm108_vm1, %v1230_v41 }
  0xbc   :  { %1478 = vmatpush3.bf16.msra.mxu0 %v1862_v38  ;;  %1361 = vmatprep.mubr.msk.f32.mxu0 %vm1721_vm0, %v1722_v10 }
  0xbd   :  { %v82_v43 = vpop.permute.xlu0 %81  ;;  %1479 = vmatprep.subr.bf16.mxu0 %v1720_v1 }
  0xbe   :  { %vm83_vm3 = vcmp.eq.s32.totalorder %v79_v34, %v82_v43 }
  0xbf   :  { %v1229_v44 = vsel %vm83_vm3, 1.0, %v1722_v10 }
  0xc0   :  { %1481 = vmatpush3.bf16.msra.mxu0 %v1872_v42  ;;  %1351 = vmatmul.mubr.msk.f32.vlgmr.msra.gmra.mrb[0].mxu1 %vm108_vm1, %v1229_v44 }
  0xc1   :  { %1484 = vmatpush3.bf16.msra.mxu1 %v1862_v38  ;;  %1372 = vmatprep.mubr.msk.f32.mxu1 %vm1721_vm0, %v1722_v10  ;;  %v374_v4 = vpop.permute.xlu0 %373 }
  0xc2   :  { %1485 = vmatprep.subr.bf16.mxu1 %v1720_v1  ;;  %1488 = vmatprep.subr.bf16.mxu0 %v1720_v1 }
  0xc3   :  { %1362 = vmatmul.mubr.msk.f32.vlgmr.msra.gmra.mrb[2].mxu0 %vm270_vm4, %v269_v32 }
  0xc4   :  { %1490 = vmatpush3.bf16.msra.mxu0 %v1862_v38  ;;  %1383 = vmatprep.mubr.msk.f32.mxu0 %vm1721_vm0, %v1722_v10 }
  0xc5   :  { %1487 = vmatpush3.bf16.msra.mxu1 %v1872_v42  ;;  %1491 = vmatprep.subr.bf16.mxu0 %v1720_v1 }
  0xc6   :  { %1494 = vmatprep.subr.bf16.mxu1 %v1720_v1 }
  0xc8   :  { %1493 = vmatpush3.bf16.msra.mxu0 %v1872_v42 }
  0xc9   :  { %1500 = vmatprep.subr.bf16.mxu0 %v1720_v1 }
 0x18e   :  { %v178_v45 = vpop.f32.mrb[0].mxu0 }
 0x18f   :  { %v1333_v46 = vpop.f32.mrb[1].mxu0 }
 0x193   :  { %v251_v47 = vpop.f32.mrb[0].mxu1 }
 0x194   :  { %v252_v49 = vadd.f32 %v251_v47, %v178_v45  ;;  %v1352_v51 = vpop.f32.mrb[1].mxu1 }
 0x196   :  { %v262_v52 = vadd.f32 %v1233_v48, %v252_v49  ;;  %v340_v53 = vpop.f32.mrb[2].mxu0 }
 0x197   :  { %v341_v54 = vadd.f32 %v340_v53, %v1899_v50  ;;  %v1363_v55 = vpop.f32.mrb[3].mxu0 }
 0x198   :  { %263 = vst [vmem:[#allocation2] sm:$0xff] %v262_v52 }
 0x199   :  { %353 = vrot.lane.b32.xlu1 %v341_v54, %s1725_s22 }
 0x19f   :  { %v344_v56 = vld [vmem:[#allocation2] sm:$0x1]  ;;  %v456_v15 = vld [vmem:[#allocation2 + $0x1] sm:$0x1]  ;;  %v560_v35 = vld [vmem:[#allocation2 + $0x2] sm:$0x1] }
 0x1a0   :  { %v345_v57 = vadd.f32 %v344_v56, %v341_v54 }
 0x1a2   :  { %v1235_v58 = vmul.f32 -1.442695, %v345_v57 }
 0x1a4   :  { %1548 = vpow2.f32 %v1235_v58  ;;  %v664_v58 = vld [vmem:[#allocation2 + $0x3] sm:$0x1] }
 0x1ae   :  { %v1549_v59 = vpop.eup %1548 }
 0x1af   :  { %v349_v60 = vadd.f32 1.0, %v1549_v59 }
 0x1b1   :  { %1550 = vrcp.f32 %v349_v60 }
 0x1bb   :  { %v1551_v61 = vpop.eup %1550 }
 0x1bc   :  { %v363_v5 = vsub.f32 1.0, %v1551_v61  ;;  %v376_v7 = vmul.f32 %v1551_v61, %v374_v4 }
 0x20b   :  { %v354_v62 = vpop.permute.xlu1 %353 }
 0x20c   :  { %v356_v63 = vmul.f32 %v1551_v61, %v354_v62 }
 0x20e   :  { %358 = vrot.lane.b32.xlu1 %v356_v63, %s1725_s22 }
 0x280   :  { %v359_v0 = vpop.permute.xlu1 %358 }
 0x281   :  { %v361_v2 = vadd.f32 %v359_v0, %v344_v56 }
 0x283   :  { %1552 = vtanh.f32 %v361_v2 }
 0x28d   :  { %v1553_v3 = vpop.eup %1552 }
 0x28e   :  { %365 = vrot.lane.b32.xlu1 %v1553_v3, %s1726_s3 }
 0x300   :  { %v366_v6 = vpop.permute.xlu1 %365 }
 0x301   :  { %v368_v8 = vmul.f32 %v366_v6, %v363_v5 }
 0x303   :  { %v377_v9 = vadd.f32 %v376_v7, %v368_v8 }
 0x305   :  { %379 = vrot.lane.b32.xlu1 %v377_v9, %s1726_s3 }
 0x377   :  { %v380_v11 = vpop.permute.xlu1 %379 }
 0x378   :  { %383 = vst.msk [vmem:[#allocation3] sm:$0x1] %vm382_vm5, %v380_v11  ;;  %1373 = vmatmul.mubr.msk.f32.vlgmr.msra.gmra.mrb[2].mxu1 %vm270_vm4, %v380_v11 }
 0x379   :  { %1496 = vmatpush3.bf16.msra.mxu1 %v1862_v38  ;;  %1394 = vmatprep.mubr.msk.f32.mxu1 %vm1721_vm0, %v1722_v10 }
 0x37a   :  { %1497 = vmatprep.subr.bf16.mxu1 %v1720_v1 }
 0x37d   :  { %1499 = vmatpush3.bf16.msra.mxu1 %v1872_v42 }
 0x37e   :  { %1506 = vmatprep.subr.bf16.mxu1 %v1720_v1 }
 0x44b   :  { %v452_v12 = vpop.f32.mrb[2].mxu1 }
 0x44c   :  { %v453_v13 = vadd.f32 %v452_v12, %v1899_v50  ;;  %v1374_v14 = vpop.f32.mrb[3].mxu1 }
 0x44e   :  { %465 = vrot.lane.b32.xlu0 %v453_v13, %s1725_s22  ;;  %v457_v16 = vadd.f32 %v456_v15, %v453_v13 }
 0x450   :  { %v1237_v17 = vmul.f32 -1.442695, %v457_v16  ;;  %v768_v16 = vld [vmem:[#allocation2 + $0x4] sm:$0x1] }
 0x452   :  { %1554 = vpow2.f32 %v1237_v17 }
 0x45c   :  { %v1555_v18 = vpop.eup %1554 }
 0x45d   :  { %v461_v19 = vadd.f32 1.0, %v1555_v18 }
 0x45f   :  { %1556 = vrcp.f32 %v461_v19 }
 0x469   :  { %v1557_v20 = vpop.eup %1556 }
 0x46a   :  { %v475_v26 = vsub.f32 1.0, %v1557_v20  ;;  %v481_v28 = vmul.f32 %v1557_v20, %v377_v9 }
 0x4c0   :  { %v466_v21 = vpop.permute.xlu0 %465 }
 0x4c1   :  { %v468_v22 = vmul.f32 %v1557_v20, %v466_v21 }
 0x4c3   :  { %470 = vrot.lane.b32.xlu1 %v468_v22, %s1725_s22 }
 0x535   :  { %v471_v23 = vpop.permute.xlu1 %470 }
 0x536   :  { %v473_v24 = vadd.f32 %v471_v23, %v456_v15 }
 0x538   :  { %1558 = vtanh.f32 %v473_v24 }
 0x542   :  { %v1559_v25 = vpop.eup %1558 }
 0x543   :  { %477 = vrot.lane.b32.xlu0 %v1559_v25, %s1726_s3 }
 0x5b5   :  { %v478_v27 = vpop.permute.xlu0 %477 }
 0x5b6   :  { %v480_v29 = vmul.f32 %v478_v27, %v475_v26 }
 0x5b8   :  { %v482_v30 = vadd.f32 %v481_v28, %v480_v29 }
 0x5ba   :  { %484 = vrot.lane.b32.xlu1 %v482_v30, %s1726_s3 }
 0x62c   :  { %v485_v31 = vpop.permute.xlu1 %484 }
 0x62d   :  { %487 = vst.msk [vmem:[#allocation3 + $0x1] sm:$0x1] %vm382_vm5, %v485_v31  ;;  %1384 = vmatmul.mubr.msk.f32.vlgmr.msra.gmra.mrb[4].mxu0 %vm270_vm4, %v485_v31 }
 0x62e   :  { %1502 = vmatpush3.bf16.msra.mxu0 %v1862_v38  ;;  %1405 = vmatprep.mubr.msk.f32.mxu0 %vm1721_vm0, %v1722_v10 }
 0x62f   :  { %1503 = vmatprep.subr.bf16.mxu0 %v1720_v1 }
 0x632   :  { %1505 = vmatpush3.bf16.msra.mxu0 %v1872_v42 }
 0x633   :  { %1512 = vmatprep.subr.bf16.mxu0 %v1720_v1 }
 0x700   :  { %v556_v32 = vpop.f32.mrb[4].mxu0 }
 0x701   :  { %v557_v33 = vadd.f32 %v556_v32, %v1899_v50  ;;  %v1385_v34 = vpop.f32.mrb[5].mxu0 }
 0x703   :  { %569 = vrot.lane.b32.xlu0 %v557_v33, %s1725_s22  ;;  %v561_v36 = vadd.f32 %v560_v35, %v557_v33 }
 0x705   :  { %v1239_v37 = vmul.f32 -1.442695, %v561_v36  ;;  %v872_v36 = vld [vmem:[#allocation2 + $0x5] sm:$0x1] }
 0x707   :  { %1560 = vpow2.f32 %v1239_v37 }
 0x711   :  { %v1561_v39 = vpop.eup %1560 }
 0x712   :  { %v565_v40 = vadd.f32 1.0, %v1561_v39 }
 0x714   :  { %1562 = vrcp.f32 %v565_v40 }
 0x71e   :  { %v1563_v41 = vpop.eup %1562 }
 0x71f   :  { %v579_v48 = vsub.f32 1.0, %v1563_v41  ;;  %v585_v51 = vmul.f32 %v1563_v41, %v482_v30 }
 0x775   :  { %v570_v43 = vpop.permute.xlu0 %569 }
 0x776   :  { %v572_v44 = vmul.f32 %v1563_v41, %v570_v43 }
 0x778   :  { %574 = vrot.lane.b32.xlu1 %v572_v44, %s1725_s22 }
 0x7ea   :  { %v575_v45 = vpop.permute.xlu1 %574 }
 0x7eb   :  { %v577_v46 = vadd.f32 %v575_v45, %v560_v35 }
 0x7ed   :  { %1564 = vtanh.f32 %v577_v46 }
 0x7f7   :  { %v1565_v47 = vpop.eup %1564 }
 0x7f8   :  { %581 = vrot.lane.b32.xlu0 %v1565_v47, %s1726_s3 }
 0x86a   :  { %v582_v49 = vpop.permute.xlu0 %581 }
 0x86b   :  { %v584_v52 = vmul.f32 %v582_v49, %v579_v48 }
 0x86d   :  { %v586_v53 = vadd.f32 %v585_v51, %v584_v52 }
 0x86f   :  { %588 = vrot.lane.b32.xlu1 %v586_v53, %s1726_s3 }
 0x8e1   :  { %v589_v54 = vpop.permute.xlu1 %588 }
 0x8e2   :  { %591 = vst.msk [vmem:[#allocation3 + $0x2] sm:$0x1] %vm382_vm5, %v589_v54  ;;  %1395 = vmatmul.mubr.msk.f32.vlgmr.msra.gmra.mrb[4].mxu1 %vm270_vm4, %v589_v54 }
 0x8e3   :  { %1508 = vmatpush3.bf16.msra.mxu1 %v1862_v38  ;;  %1416 = vmatprep.mubr.msk.f32.mxu1 %vm1721_vm0, %v1722_v10 }
 0x8e4   :  { %1509 = vmatprep.subr.bf16.mxu1 %v1720_v1 }
 0x8e7   :  { %1511 = vmatpush3.bf16.msra.mxu1 %v1872_v42 }
 0x8e8   :  { %1518 = vmatprep.subr.bf16.mxu1 %v1720_v1 }
 0x9b5   :  { %v660_v55 = vpop.f32.mrb[4].mxu1 }
 0x9b6   :  { %v661_v56 = vadd.f32 %v660_v55, %v1899_v50  ;;  %v1396_v57 = vpop.f32.mrb[5].mxu1 }
 0x9b7   :  { %v976_v57 = vld [vmem:[#allocation2 + $0x6] sm:$0x1] }
 0x9b8   :  { %673 = vrot.lane.b32.xlu0 %v661_v56, %s1725_s22  ;;  %v665_v59 = vadd.f32 %v664_v58, %v661_v56 }
 0x9ba   :  { %v1241_v60 = vmul.f32 -1.442695, %v665_v59 }
 0x9bc   :  { %1566 = vpow2.f32 %v1241_v60 }
 0x9c6   :  { %v1567_v61 = vpop.eup %1566 }
 0x9c7   :  { %v669_v62 = vadd.f32 1.0, %v1567_v61 }
 0x9c9   :  { %1568 = vrcp.f32 %v669_v62 }
 0x9d3   :  { %v1569_v63 = vpop.eup %1568 }
 0x9d4   :  { %v683_v6 = vsub.f32 1.0, %v1569_v63  ;;  %v689_v8 = vmul.f32 %v1569_v63, %v586_v53 }
 0xa2a   :  { %v674_v0 = vpop.permute.xlu0 %673 }
 0xa2b   :  { %v676_v2 = vmul.f32 %v1569_v63, %v674_v0 }
 0xa2d   :  { %678 = vrot.lane.b32.xlu1 %v676_v2, %s1725_s22 }
 0xa9f   :  { %v679_v3 = vpop.permute.xlu1 %678 }
 0xaa0   :  { %v681_v4 = vadd.f32 %v679_v3, %v664_v58 }
 0xaa2   :  { %1570 = vtanh.f32 %v681_v4 }
 0xaac   :  { %v1571_v5 = vpop.eup %1570 }
 0xaad   :  { %685 = vrot.lane.b32.xlu0 %v1571_v5, %s1726_s3 }
 0xb1f   :  { %v686_v7 = vpop.permute.xlu0 %685 }
 0xb20   :  { %v688_v9 = vmul.f32 %v686_v7, %v683_v6 }
 0xb22   :  { %v690_v11 = vadd.f32 %v689_v8, %v688_v9 }
 0xb24   :  { %692 = vrot.lane.b32.xlu1 %v690_v11, %s1726_s3 }
 0xb96   :  { %v693_v12 = vpop.permute.xlu1 %692 }
 0xb97   :  { %695 = vst.msk [vmem:[#allocation3 + $0x3] sm:$0x1] %vm382_vm5, %v693_v12  ;;  %1406 = vmatmul.mubr.msk.f32.vlgmr.msra.gmra.mrb[6].mxu0 %vm270_vm4, %v693_v12 }
 0xb98   :  { %1514 = vmatpush3.bf16.msra.mxu0 %v1862_v38  ;;  %1427 = vmatprep.mubr.msk.f32.mxu0 %vm1721_vm0, %v1722_v10 }
 0xb99   :  { %1515 = vmatprep.subr.bf16.mxu0 %v1720_v1 }
 0xb9c   :  { %1517 = vmatpush3.bf16.msra.mxu0 %v1872_v42 }
 0xb9d   :  { %1524 = vmatprep.subr.bf16.mxu0 %v1720_v1 }
 0xc6a   :  { %v764_v13 = vpop.f32.mrb[6].mxu0 }
 0xc6b   :  { %v765_v14 = vadd.f32 %v764_v13, %v1899_v50  ;;  %v1407_v15 = vpop.f32.mrb[7].mxu0 }
 0xc6d   :  { %777 = vrot.lane.b32.xlu0 %v765_v14, %s1725_s22  ;;  %v769_v17 = vadd.f32 %v768_v16, %v765_v14  ;;  %v1080_v14 = vld [vmem:[#allocation2 + $0x7] sm:$0x1] }
 0xc6f   :  { %v1243_v18 = vmul.f32 -1.442695, %v769_v17 }
 0xc71   :  { %1572 = vpow2.f32 %v1243_v18 }
 0xc7b   :  { %v1573_v19 = vpop.eup %1572 }
 0xc7c   :  { %v773_v20 = vadd.f32 1.0, %v1573_v19 }
 0xc7e   :  { %1574 = vrcp.f32 %v773_v20 }
 0xc88   :  { %v1575_v21 = vpop.eup %1574 }
 0xc89   :  { %v787_v27 = vsub.f32 1.0, %v1575_v21  ;;  %v793_v29 = vmul.f32 %v1575_v21, %v690_v11 }
 0xcdf   :  { %v778_v22 = vpop.permute.xlu0 %777 }
 0xce0   :  { %v780_v23 = vmul.f32 %v1575_v21, %v778_v22 }
 0xce2   :  { %782 = vrot.lane.b32.xlu1 %v780_v23, %s1725_s22 }
 0xd54   :  { %v783_v24 = vpop.permute.xlu1 %782 }
 0xd55   :  { %v785_v25 = vadd.f32 %v783_v24, %v768_v16 }
 0xd57   :  { %1576 = vtanh.f32 %v785_v25  ;;  %v1115_v25 = vld [vmem:[#allocation9 + $0x8] sm:$0xff] }
 0xd61   :  { %v1577_v26 = vpop.eup %1576 }
 0xd62   :  { %789 = vrot.lane.b32.xlu0 %v1577_v26, %s1726_s3 }
 0xdd4   :  { %v790_v28 = vpop.permute.xlu0 %789 }
 0xdd5   :  { %v792_v30 = vmul.f32 %v790_v28, %v787_v27  ;;  %v1116_v27 = vld [vmem:[#allocation9 + $0x10] sm:$0xff]  ;;  %v1117_v28 = vld [vmem:[#allocation9 + $0x18] sm:$0xff] }
 0xdd7   :  { %v794_v31 = vadd.f32 %v793_v29, %v792_v30  ;;  %v1528_v29 = vpack.c.bf16 %v1117_v28, %v1116_v27 }
 0xdd9   :  { %796 = vrot.lane.b32.xlu1 %v794_v31, %s1726_s3 }
 0xe4b   :  { %v797_v32 = vpop.permute.xlu1 %796 }
 0xe4c   :  { %799 = vst.msk [vmem:[#allocation3 + $0x4] sm:$0x1] %vm382_vm5, %v797_v32  ;;  %1417 = vmatmul.mubr.msk.f32.vlgmr.msra.gmra.mrb[6].mxu1 %vm270_vm4, %v797_v32 }
 0xe4d   :  { %1520 = vmatpush3.bf16.msra.mxu1 %v1862_v38  ;;  %1438 = vmatprep.mubr.msk.f32.mxu1 %vm1721_vm0, %v1722_v10 }
 0xe4e   :  { %1521 = vmatprep.subr.bf16.mxu1 %v1720_v1 }
 0xe51   :  { %1523 = vmatpush3.bf16.msra.mxu1 %v1872_v42 }
 0xf1f   :  { %v868_v33 = vpop.f32.mrb[6].mxu1 }
 0xf20   :  { %v869_v34 = vadd.f32 %v868_v33, %v1899_v50  ;;  %v1418_v35 = vpop.f32.mrb[7].mxu1 }
 0xf22   :  { %881 = vrot.lane.b32.xlu0 %v869_v34, %s1725_s22  ;;  %v873_v37 = vadd.f32 %v872_v36, %v869_v34 }
 0xf24   :  { %v1245_v39 = vmul.f32 -1.442695, %v873_v37 }
 0xf26   :  { %1578 = vpow2.f32 %v1245_v39 }
 0xf30   :  { %v1579_v40 = vpop.eup %1578 }
 0xf31   :  { %v877_v41 = vadd.f32 1.0, %v1579_v40 }
 0xf33   :  { %1580 = vrcp.f32 %v877_v41 }
 0xf3d   :  { %v1581_v38 = vpop.eup %1580 }
 0xf3e   :  { %v891_v47 = vsub.f32 1.0, %v1581_v38  ;;  %v897_v49 = vmul.f32 %v1581_v38, %v794_v31 }
 0xf94   :  { %v882_v43 = vpop.permute.xlu0 %881 }
 0xf95   :  { %v884_v44 = vmul.f32 %v1581_v38, %v882_v43 }
 0xf97   :  { %886 = vrot.lane.b32.xlu1 %v884_v44, %s1725_s22 }
0x1009   :  { %v887_v45 = vpop.permute.xlu1 %886 }
0x100a   :  { %v889_v42 = vadd.f32 %v887_v45, %v872_v36 }
0x100c   :  { %1582 = vtanh.f32 %v889_v42 }
0x1016   :  { %v1583_v46 = vpop.eup %1582 }
0x1017   :  { %893 = vrot.lane.b32.xlu0 %v1583_v46, %s1726_s3 }
0x1089   :  { %v894_v48 = vpop.permute.xlu0 %893 }
0x108a   :  { %v896_v51 = vmul.f32 %v894_v48, %v891_v47 }
0x108c   :  { %v898_v52 = vadd.f32 %v897_v49, %v896_v51 }
0x108e   :  { %900 = vrot.lane.b32.xlu1 %v898_v52, %s1726_s3 }
0x1100   :  { %v901_v53 = vpop.permute.xlu1 %900 }
0x1101   :  { %903 = vst.msk [vmem:[#allocation3 + $0x5] sm:$0x1] %vm382_vm5, %v901_v53  ;;  %1428 = vmatmul.mubr.msk.f32.vlgmr.msra.gmra.mrb[8].mxu0 %vm270_vm4, %v901_v53 }
0x1102   :  { %1449 = vmatprep.mubr.msk.f32.mxu0 %vm1721_vm0, %v1722_v10 }
0x11d4   :  { %v972_v54 = vpop.f32.mrb[8].mxu0 }
0x11d5   :  { %v973_v55 = vadd.f32 %v972_v54, %v1899_v50  ;;  %v1429_v56 = vpop.f32.mrb[9].mxu0 }
0x11d7   :  { %985 = vrot.lane.b32.xlu0 %v973_v55, %s1725_s22  ;;  %v977_v58 = vadd.f32 %v976_v57, %v973_v55 }
0x11d9   :  { %v1247_v59 = vmul.f32 -1.442695, %v977_v58 }
0x11db   :  { %1584 = vpow2.f32 %v1247_v59 }
0x11e5   :  { %v1585_v60 = vpop.eup %1584 }
0x11e6   :  { %v981_v61 = vadd.f32 1.0, %v1585_v60 }
0x11e8   :  { %1586 = vrcp.f32 %v981_v61 }
0x11f2   :  { %v1587_v62 = vpop.eup %1586 }
0x11f3   :  { %v995_v4 = vsub.f32 1.0, %v1587_v62  ;;  %v1001_v6 = vmul.f32 %v1587_v62, %v898_v52 }
0x1249   :  { %v986_v63 = vpop.permute.xlu0 %985 }
0x124a   :  { %v988_v0 = vmul.f32 %v1587_v62, %v986_v63 }
0x124c   :  { %990 = vrot.lane.b32.xlu1 %v988_v0, %s1725_s22 }
0x12be   :  { %v991_v2 = vpop.permute.xlu1 %990 }
0x12bf   :  { %v993_v10 = vadd.f32 %v991_v2, %v976_v57 }
0x12c1   :  { %1588 = vtanh.f32 %v993_v10 }
0x12cb   :  { %v1589_v3 = vpop.eup %1588 }
0x12cc   :  { %997 = vrot.lane.b32.xlu0 %v1589_v3, %s1726_s3 }
0x133e   :  { %v998_v5 = vpop.permute.xlu0 %997 }
0x133f   :  { %v1000_v7 = vmul.f32 %v998_v5, %v995_v4 }
0x1341   :  { %v1002_v8 = vadd.f32 %v1001_v6, %v1000_v7 }
0x1343   :  { %1004 = vrot.lane.b32.xlu1 %v1002_v8, %s1726_s3 }
0x13b5   :  { %v1005_v9 = vpop.permute.xlu1 %1004 }
0x13b6   :  { %1007 = vst.msk [vmem:[#allocation3 + $0x6] sm:$0x1] %vm382_vm5, %v1005_v9  ;;  %1439 = vmatmul.mubr.msk.f32.vlgmr.msra.gmra.mrb[8].mxu1 %vm270_vm4, %v1005_v9 }
0x1489   :  { %v1076_v11 = vpop.f32.mrb[8].mxu1 }
0x148a   :  { %v1077_v12 = vadd.f32 %v1076_v11, %v1899_v50  ;;  %v1440_v13 = vpop.f32.mrb[9].mxu1  ;;  %v1114_v50 = vld [vmem:[#allocation9] sm:$0xff] }
0x148b   :  { %v1525_v26 = vpack.c.bf16 %v1115_v25, %v1114_v50 }
0x148c   :  { %1089 = vrot.lane.b32.xlu0 %v1077_v12, %s1725_s22  ;;  %v1081_v15 = vadd.f32 %v1080_v14, %v1077_v12 }
0x148d   :  { %1526 = vmatpush3.bf16.msra.mxu0 %v1525_v26 }
0x148e   :  { %v1249_v16 = vmul.f32 -1.442695, %v1081_v15  ;;  %1527 = vmatprep.subr.bf16.mxu0 %v1720_v1 }
0x1490   :  { %1590 = vpow2.f32 %v1249_v16 }
0x1491   :  { %1529 = vmatpush3.bf16.msra.mxu0 %v1528_v29 }
0x149a   :  { %v1591_v17 = vpop.eup %1590 }
0x149b   :  { %v1085_v18 = vadd.f32 1.0, %v1591_v17 }
0x149d   :  { %1592 = vrcp.f32 %v1085_v18 }
0x14a7   :  { %v1593_v19 = vpop.eup %1592 }
0x14a8   :  { %v1099_v30 = vsub.f32 1.0, %v1593_v19  ;;  %v1105_v32 = vmul.f32 %v1593_v19, %v1002_v8 }
0x14fe   :  { %v1090_v20 = vpop.permute.xlu0 %1089 }
0x14ff   :  { %v1092_v21 = vmul.f32 %v1593_v19, %v1090_v20 }
0x1501   :  { %1094 = vrot.lane.b32.xlu1 %v1092_v21, %s1725_s22 }
0x1573   :  { %v1095_v22 = vpop.permute.xlu1 %1094 }
0x1574   :  { %v1097_v23 = vadd.f32 %v1095_v22, %v1080_v14 }
0x1576   :  { %1594 = vtanh.f32 %v1097_v23 }
0x1580   :  { %v1595_v24 = vpop.eup %1594 }
0x1581   :  { %1101 = vrot.lane.b32.xlu0 %v1595_v24, %s1726_s3 }
0x15f3   :  { %v1102_v31 = vpop.permute.xlu0 %1101 }
0x15f4   :  { %v1104_v33 = vmul.f32 %v1102_v31, %v1099_v30 }
0x15f6   :  { %v1106_v34 = vadd.f32 %v1105_v32, %v1104_v33 }
0x15f8   :  { %1108 = vrot.lane.b32.xlu1 %v1106_v34, %s1726_s3 }
0x166a   :  { %v1109_v35 = vpop.permute.xlu1 %1108 }
0x166b   :  { %1111 = vst.msk [vmem:[#allocation3 + $0x7] sm:$0x1] %vm382_vm5, %v1109_v35  ;;  %1112 = vst.msk [vmem:[#allocation11] sm:$0x1] %vm382_vm5, %v1109_v35 }
0x1672   :  { %v1113_v36 = vld [vmem:[#allocation3] sm:$0xff] }
0x1673   :  { %1450 = vmatmul.mubr.msk.f32.vlgmr.msra.gmra.mrb[10].mxu0 %vm270_vm4, %v1113_v36 }
0x1674   :  { %1673 = shalt.err (!%p1670_p0)
}
0x1675   :  { %s1674_s30 = scalar_lea.hbm %s2027_s10, 16 }
0x1676   :  { %p1675_p1 = scmp.ne.s32.totalorder %s2027_s10, %s1674_s30  ;;  %p1678_p2 = scmp.lt.u32.totalorder %s1674_s30, %s2027_s10 }
0x1678   :  { %p1680_p3 = pnand %p1678_p2, %p1675_p1 }
0x167a   :  { %1683 = shalt.err (!%p1680_p3)
}
0x167b   :  { %1218 = dma.vmem_to_hbm [thread:$0]  %s1216_s23, 16, %s2027_s10, [#allocation12]   ;;  %v1250_v1 = vld [vmem:[%s2024_s7] ss:$0 sm:$0xff] }
0x167c   :  { %s1728_s13 = smov [#allocation10]  }
0x167d   :  { %s1205_s15 = sshll.u32 %s1728_s13, 4  ;;  %s1206_s15 = int_to_ptr.vmem [resolvable:$true] %s1205_s15 }
0x167e   :  { %s1684_s17 = scalar_lea.vmem %s1206_s15, 128  ;;  %p1689_p5 = scmp.lt.s32.totalorder %s1206_s15, %s1206_s15 }
0x167f   :  { %p1685_p4 = scmp.ne.s32.totalorder %s1206_s15, %s1684_s17  ;;  %p1690_p6 = scmp.lt.s32.totalorder %s1684_s17, %s1684_s17 }
0x1681   :  { %p1691_p7 = por %p1690_p6, %p1689_p5 }
0x1683   :  { %p1692_p8 = pnand %p1691_p7, %p1685_p4 }
0x1746   :  { %v1194_v37 = vpop.f32.mrb[10].mxu0 }
0x1747   :  { %v1195_v39 = vadd.f32 %v1250_v1, %v1194_v37  ;;  %v1451_v40 = vpop.f32.mrb[11].mxu0 }
0x1749   :  { %1198 = vst [vmem:[#allocation10] sm:$0xff] %v1195_v39 }
0x174a   :  { %1695 = shalt.err (!%p1692_p8)
}
0x174b   :  { %s1696_s18 = scalar_lea.hbm %s2026_s9, 128 }
0x174c   :  { %p1697_p9 = scmp.ne.s32.totalorder %s2026_s9, %s1696_s18  ;;  %p1700_p10 = scmp.lt.u32.totalorder %s1696_s18, %s2026_s9 }
0x174e   :  { %p1702_p11 = pnand %p1700_p10, %p1697_p9 }
0x1750   :  { %1705 = shalt.err (!%p1702_p11)
}
0x1751   :  { %1208 = dma.vmem_to_hbm [thread:$0]  %s1206_s15, 128, %s2026_s9, [#allocation6]  }
0x1752   :  { %1710 = dma.done.wait [#allocation6], 128  }
0x1753   :  { %1711 = vsyncadd [#allocation6], 4294967168 }
0x1754   :  { %1712 = dma.done.wait [#allocation12], 16  }
0x1755   :  { %1713 = vsyncadd [#allocation12], 4294967280 }
0x1756   :  { %1225 = vsyncpa [#allocation5], 1 }
0x1757   :  { %1226 = vsyncpa [#allocation8], 1 }
0x1758   :  { %1227 = vsyncpa [#allocation6], 1 }
0x1759   :  { %1228 = vsyncpa [#allocation12], 1 }

</bundles_post_ra>
